<compile_context>
chip_gen: v5e
topology: v5e:2x2
jax: 0.10.0
libtpu: 0.0.40
codegen_flags: <defaults>
</compile_context>

<pallas_src>
import functools

import jax
import jax.numpy as jnp
from jax.experimental import pallas as pl
from jax.experimental.pallas import tpu as pltpu


# ----------------------------------------------------------------------------
# Linear:  y = x @ W^T + b     (PyTorch nn.Linear convention, W: (Cout, Cin))
# ----------------------------------------------------------------------------
def _linear_kernel(x_ref, w_ref, b_ref, o_ref):
    x = x_ref[...]                           # (tm, Cin)
    w = w_ref[...]                           # (Cout, Cin) -- trans-B contraction
    y = jax.lax.dot_general(
        x, w, (((1,), (1,)), ((), ())),      # contract last dim of both (x @ W^T)
        preferred_element_type=jnp.float32)
    o_ref[...] = (y + b_ref[...]).astype(o_ref.dtype)


def linear(x, w, b, *, tm=512):
    m, cin = x.shape
    cout, _ = w.shape
    # Row tile: full M when small (block == full dim is always legal), else 512
    # rows (multiple of 8 sublanes).  A ragged last block is handled by Pallas
    # (OOB reads are padded, OOB writes are masked) and the op is row-wise.
    tm = m if m <= tm else tm
    grid = (pl.cdiv(m, tm),)
    cost = pl.CostEstimate(
        flops=2 * m * cin * cout,
        transcendentals=0,
        bytes_accessed=4 * (m * cin + cout * cin + cout + m * cout))
    return pl.pallas_call(
        _linear_kernel,
        out_shape=jax.ShapeDtypeStruct((m, cout), x.dtype),
        grid=grid,
        in_specs=[
            pl.BlockSpec((tm, cin), lambda i: (i, 0)),    # pipelined row tile
            pl.BlockSpec((cout, cin), lambda i: (0, 0)),  # resident weights
            pl.BlockSpec((1, cout), lambda i: (0, 0)),    # resident bias
        ],
        out_specs=pl.BlockSpec((tm, cout), lambda i: (i, 0)),
        compiler_params=pltpu.CompilerParams(
            dimension_semantics=("parallel",)),
        cost_estimate=cost,
    )(x, w, b.reshape(1, cout))


# ----------------------------------------------------------------------------
# Flash attention over (B, N, C) with heads handled inside the kernel.
#   grid = (B, N//tq, N//tk); KV axis last ("arbitrary"), online softmax.
# ----------------------------------------------------------------------------
def _flash_attn_kernel(q_ref, k_ref, v_ref, o_ref, m_ref, l_ref, acc_ref, *,
                       nhead, head_dim, scale, seq_len):
    ki = pl.program_id(2)

    @pl.when(ki == 0)
    def _init():
        m_ref[...] = jnp.full(m_ref.shape, -jnp.inf, dtype=m_ref.dtype)
        l_ref[...] = jnp.zeros(l_ref.shape, dtype=l_ref.dtype)
        acc_ref[...] = jnp.zeros(acc_ref.shape, dtype=acc_ref.dtype)

    q = q_ref[0].astype(jnp.float32) * scale     # (tq, C); scale folded into q
    k = k_ref[0].astype(jnp.float32)             # (tk, C)
    v = v_ref[0].astype(jnp.float32)             # (tk, C)

    tk = k.shape[0]
    need_mask = (seq_len % tk) != 0              # static at trace time
    if need_mask:
        kv_ids = ki * tk + jax.lax.broadcasted_iota(jnp.int32, (1, tk), 1)
        kv_valid = kv_ids < seq_len              # (1, tk)

    trans_b = (((1,), (1,)), ((), ()))           # contract last dims: Q @ K^T

    for h in range(nhead):                       # static, unrolled head loop
        cols = slice(h * head_dim, (h + 1) * head_dim)
        q_h = q[:, cols]                         # (tq, D) static lane slice
        k_h = k[:, cols]                         # (tk, D)
        v_h = v[:, cols]                         # (tk, D)

        s = jax.lax.dot_general(q_h, k_h, trans_b,
                                preferred_element_type=jnp.float32)  # (tq, tk)
        if need_mask:
            s = jnp.where(kv_valid, s, -jnp.inf)

        m_prev = m_ref[:, h:h + 1]               # (tq, 1)
        l_prev = l_ref[:, h:h + 1]
        m_new = jnp.maximum(m_prev, jnp.max(s, axis=-1, keepdims=True))
        alpha = jnp.exp(m_prev - m_new)
        p = jnp.exp(s - m_new)                   # (tq, tk)
        l_ref[:, h:h + 1] = alpha * l_prev + jnp.sum(p, axis=-1, keepdims=True)
        m_ref[:, h:h + 1] = m_new
        acc_ref[:, cols] = alpha * acc_ref[:, cols] + jnp.dot(
            p, v_h, preferred_element_type=jnp.float32)

    @pl.when(ki == pl.num_programs(2) - 1)
    def _finalize():
        for h in range(nhead):
            cols = slice(h * head_dim, (h + 1) * head_dim)
            # one divide per row, then a cheap broadcast multiply
            inv_l = pl.reciprocal(l_ref[:, h:h + 1], approx=False)
            o_ref[0, :, cols] = (acc_ref[:, cols] * inv_l).astype(o_ref.dtype)


def multihead_attention(q, k, v, *, nhead, scale, tq=256, tk=256):
    b, n, c = q.shape
    d = c // nhead
    tq = n if n <= tq else tq                    # full dim when small, else 256
    tk = n if n <= tk else tk
    grid = (b, pl.cdiv(n, tq), pl.cdiv(n, tk))

    kernel = functools.partial(_flash_attn_kernel, nhead=nhead, head_dim=d,
                               scale=scale, seq_len=n)
    q_spec = pl.BlockSpec((1, tq, c), lambda bi, qi, ki: (bi, qi, 0))
    kv_spec = pl.BlockSpec((1, tk, c), lambda bi, qi, ki: (bi, ki, 0))
    o_spec = pl.BlockSpec((1, tq, c), lambda bi, qi, ki: (bi, qi, 0))

    cost = pl.CostEstimate(
        flops=4 * b * n * n * c,                 # QK^T + PV over all heads
        transcendentals=b * nhead * n * n,       # exp
        bytes_accessed=4 * 4 * b * n * c)        # q,k,v in + out

    return pl.pallas_call(
        kernel,
        out_shape=jax.ShapeDtypeStruct((b, n, c), q.dtype),
        grid=grid,
        in_specs=[q_spec, kv_spec, kv_spec],
        out_specs=o_spec,
        scratch_shapes=[
            pltpu.VMEM((tq, nhead), jnp.float32),  # running max  m (per head)
            pltpu.VMEM((tq, nhead), jnp.float32),  # running sum  l (per head)
            pltpu.VMEM((tq, c), jnp.float32),      # lane-dense output accumulator
        ],
        compiler_params=pltpu.CompilerParams(
            dimension_semantics=("parallel", "parallel", "arbitrary")),
        cost_estimate=cost,
    )(q, k, v)


# ----------------------------------------------------------------------------
# Full module forward (no HBM head split/merge transposes anywhere)
# ----------------------------------------------------------------------------
def attention_forward(params, q_in, k_in, v_in, nhead):
    b, n, c = q_in.shape
    d = c // nhead
    scale = float(d) ** -0.5

    def proj(x, w, bias):
        return linear(x.reshape(b * n, c), w, bias).reshape(b, n, c)

    q = proj(q_in, params["wq"], params["bq"])
    k = proj(k_in, params["wk"], params["bk"])
    v = proj(v_in, params["wv"], params["bv"])

    out = multihead_attention(q, k, v, nhead=nhead, scale=scale)  # (B, N, C)

    out = linear(out.reshape(b * n, c), params["wo"], params["bo"])
    return out.reshape(b, n, c)


def init_params(key, c):
    ks = jax.random.split(key, 8)
    lim = (1.0 / c) ** 0.5  # matches PyTorch Linear init range
    def u(k, shape):
        return jax.random.uniform(k, shape, jnp.float32, -lim, lim)
    return {
        "wq": u(ks[0], (c, c)), "bq": u(ks[1], (c,)),
        "wk": u(ks[2], (c, c)), "bk": u(ks[3], (c,)),
        "wv": u(ks[4], (c, c)), "bv": u(ks[5], (c,)),
        "wo": u(ks[6], (c, c)), "bo": u(ks[7], (c,)),
    }


def _reference(params, q_in, k_in, v_in, nhead):
    """Pure-JAX reference for correctness check."""
    b, n, c = q_in.shape
    d = c // nhead
    scale = float(d) ** -0.5

    def lin(x, w, bias):
        return x @ w.T + bias

    q = lin(q_in, params["wq"], params["bq"]).reshape(b, n, nhead, d)
    k = lin(k_in, params["wk"], params["bk"]).reshape(b, n, nhead, d)
    v = lin(v_in, params["wv"], params["bv"]).reshape(b, n, nhead, d)
    q, k, v = (x.transpose(0, 2, 1, 3) for x in (q, k, v))  # (B,H,N,D)
    s = jnp.einsum("bhqd,bhkd->bhqk", q, k) * scale
    p = jax.nn.softmax(s, axis=-1)
    o = jnp.einsum("bhqk,bhkd->bhqd", p, v)
    o = o.transpose(0, 2, 1, 3).reshape(b, n, c)
    return lin(o, params["wo"], params["bo"])


if __name__ == "__main__":
    B, N, C, NHEAD = 2, 8, 32, 4

    key = jax.random.PRNGKey(0)
    kp, kq, kk, kv = jax.random.split(key, 4)
    params = init_params(kp, C)
    q_in = jax.random.normal(kq, (B, N, C), jnp.float32)
    k_in = jax.random.normal(kk, (B, N, C), jnp.float32)
    v_in = jax.random.normal(kv, (B, N, C), jnp.float32)

    out = attention_forward(params, q_in, k_in, v_in, NHEAD)
    out = jax.block_until_ready(out)

    ref = _reference(params, q_in, k_in, v_in, NHEAD)
    assert out.shape == (B, N, C)
    assert jnp.allclose(out, ref, atol=1e-4, rtol=1e-4), "mismatch vs reference"

    print("KERNEL_OK")
</pallas_src>

<mosaic_0001>
module attributes {stable_mosaic.version = 11 : i64} {
  func.func @_linear_kernel(%arg0: i32, %arg1: memref<16x32xf32, #tpu.memory_space<vmem>>, %arg2: memref<32x32xf32, #tpu.memory_space<vmem>>, %arg3: memref<1x32xf32, #tpu.memory_space<vmem>>, %arg4: memref<16x32xf32, #tpu.memory_space<vmem>>) attributes {dimension_semantics = [#tpu.dimension_semantics<parallel>], iteration_bounds = array<i64: 1>, scalar_prefetch = 0 : i64, scratch_operands = 0 : i64, tpu.core_type = #tpu.core_type<tc>, window_params = [{transform_indices = @transform_0, window_bounds = array<i64: 16, 32>}, {pipeline_mode = #tpu.pipeline_mode<synchronous>, transform_indices = @transform_1, window_bounds = array<i64: 32, 32>}, {pipeline_mode = #tpu.pipeline_mode<synchronous>, transform_indices = @transform_2, window_bounds = array<i64: 1, 32>}, {transform_indices = @transform_3, window_bounds = array<i64: 16, 32>}]} {
    %c0 = arith.constant 0 : index
    %c0_0 = arith.constant 0 : index
    %0 = vector.load %arg1[%c0, %c0_0] : memref<16x32xf32, #tpu.memory_space<vmem>>, vector<16x32xf32>
    %c0_1 = arith.constant 0 : index
    %c0_2 = arith.constant 0 : index
    %1 = vector.load %arg2[%c0_1, %c0_2] : memref<32x32xf32, #tpu.memory_space<vmem>>, vector<32x32xf32>
    %cst = arith.constant dense<0.000000e+00> : vector<16x32xf32>
    %2 = tpu.matmul %0, %1, %cst {dimension_numbers = #tpu.dot_dimension_numbers<[1], [1], [0], [0], [0, 0, 1, 0], [], []>} : vector<16x32xf32>, vector<32x32xf32>, vector<16x32xf32> -> vector<16x32xf32>
    %c0_3 = arith.constant 0 : index
    %c0_4 = arith.constant 0 : index
    %3 = vector.load %arg3[%c0_3, %c0_4] : memref<1x32xf32, #tpu.memory_space<vmem>>, vector<1x32xf32>
    %4 = vector.broadcast %3 : vector<1x32xf32> to vector<16x32xf32>
    %5 = arith.addf %2, %4 : vector<16x32xf32>
    %c0_5 = arith.constant 0 : index
    %c0_6 = arith.constant 0 : index
    %6 = vector.load %arg4[%c0_5, %c0_6] : memref<16x32xf32, #tpu.memory_space<vmem>>, vector<16x32xf32>
    tpu.vector_store %arg4[%c0_5, %c0_6], %5 {strides = array<i32>} : memref<16x32xf32, #tpu.memory_space<vmem>>, vector<16x32xf32>,
    return
  }
  func.func @transform_0(%arg0: i32) -> (i32, i32) {
    %c0_i32 = arith.constant 0 : i32
    %c0_i32_0 = arith.constant 0 : i32
    return %arg0, %c0_i32 : i32, i32
  }
  func.func @transform_1(%arg0: i32) -> (i32, i32) {
    %c0_i32 = arith.constant 0 : i32
    %c0_i32_0 = arith.constant 0 : i32
    %c0_i32_1 = arith.constant 0 : i32
    return %c0_i32, %c0_i32_0 : i32, i32
  }
  func.func @transform_2(%arg0: i32) -> (i32, i32) {
    %c0_i32 = arith.constant 0 : i32
    %c0_i32_0 = arith.constant 0 : i32
    %c0_i32_1 = arith.constant 0 : i32
    return %c0_i32, %c0_i32_0 : i32, i32
  }
  func.func @transform_3(%arg0: i32) -> (i32, i32) {
    %c0_i32 = arith.constant 0 : i32
    %c0_i32_0 = arith.constant 0 : i32
    return %arg0, %c0_i32 : i32, i32
  }
}

</mosaic_0001>

<bundles_post_ra>
// kernel: tpu_custom_call.1
= control target key start
LH: loop header
LB: loop body
LE: loop exit
PB: predicated region body
PF: predicated region fallthrough
CT: control target
= control target key end

     0   :  { %8 = vsyncpa [#allocation3], 0  ;;  %s273_s0 = inlined_call_operand.hbm [shape: f32[16,32], index: 0, kind: input, shape index: {}]   ;;  %s274_s1 = inlined_call_operand.hbm [shape: f32[32,32], index: 1, kind: input, shape index: {}]   ;;  %s275_s2 = inlined_call_operand.vmem [shape: f32[1,32], index: 2, kind: input, shape index: {}]   ;;  %s276_s3 = inlined_call_operand.hbm [shape: f32[16,32], index: 3, kind: output, shape index: {}]  }
   0x1   :  { %9 = vsyncpa [#allocation6], 0 }
   0x2   :  { %10 = vsyncpa [#allocation4], 0  ;;  %s15_s14 = sshll.u32 %s273_s0, 4  ;;  %s215_s15 = smov [#allocation2]   ;;  %s16_s14 = int_to_ptr.hbm [resolvable:$true] %s15_s14 }
   0x3   :  { %s17_s16 = sshll.u32 %s215_s15, 4  ;;  %s28_s19 = sshll.u32 %s274_s1, 4  ;;  %s18_s16 = int_to_ptr.vmem [resolvable:$true] %s17_s16  ;;  %s29_s19 = int_to_ptr.hbm [resolvable:$true] %s28_s19 }
   0x4   :  { %s216_s20 = smov 128   ;;  %s217_s21 = smov 8  }
   0x5   :  { %23 = dma.hbm_to_vmem [thread:$0]  %s16_s14, 256, %s18_s16, [#allocation3], %s216_s20, %s216_s20, %s217_s21  }
   0x6   :  { %s218_s22 = smov [#allocation5]  }
   0x7   :  { %s30_s23 = sshll.u32 %s218_s22, 4  ;;  %s31_s23 = int_to_ptr.vmem [resolvable:$true] %s30_s23 }
   0x8   :  { %36 = dma.hbm_to_vmem [thread:$0]  %s29_s19, 512, %s31_s23, [#allocation6], %s216_s20, %s216_s20, %s217_s21  }
   0x9   :  { %209 = dma.done.wait [#allocation3], 256  }
   0xa   :  { %210 = vsyncadd [#allocation3], 4294967040 }
   0xb   :  { %211 = dma.done.wait [#allocation6], 512  }
   0xc   :  { %212 = vsyncadd [#allocation6], 4294966784  ;;  %vm57_vm0 = vcmask 261120   ;;  %v52_v0 = vld [vmem:[#allocation5 + $0x18] sm:$0xff]  ;;  %v51_v1 = vld [vmem:[#allocation5 + $0x10] sm:$0xff]  ;;  %s219_s24 = smov [#allocation7]  }
   0xd   :  { %121 = vmatpush.xpose.msk.msra.mxu0 %vm57_vm0, %v52_v0  ;;  %127 = vmatpush.xpose.msk.msra.mxu1 %vm57_vm0, %v52_v0  ;;  %v50_v2 = vld [vmem:[#allocation5 + $0x8] sm:$0xff]  ;;  %v49_v3 = vld [vmem:[#allocation5] sm:$0xff]  ;;  %v47_v4 = vld [vmem:[#allocation2] sm:$0xff]  ;;  %s105_s25 = sshll.u32 %s219_s24, 4  ;;  %s107_s28 = sshll.u32 %s276_s3, 4  ;;  %s106_s25 = int_to_ptr.vmem [resolvable:$true] %s105_s25  ;;  %s108_s28 = int_to_ptr.hbm [resolvable:$true] %s107_s28 }
   0xe   :  { %v48_v5 = vld [vmem:[#allocation2 + $0x8] sm:$0xff]  ;;  %v136_v6 = vld [vmem:[%s275_s2] ss:$0 sm:$0xff] }
  0x11   :  { %122 = vmatpush.xpose.msk.msra.mxu0 %vm57_vm0, %v51_v1  ;;  %128 = vmatpush.xpose.msk.msra.mxu1 %vm57_vm0, %v51_v1 }
  0x15   :  { %123 = vmatpush.xpose.msk.msra.mxu0 %vm57_vm0, %v50_v2  ;;  %129 = vmatpush.xpose.msk.msra.mxu1 %vm57_vm0, %v50_v2 }
  0x19   :  { %124 = vmatpush.xpose.msk.msra.mxu0 %vm57_vm0, %v49_v3  ;;  %130 = vmatpush.xpose.msk.msra.mxu1 %vm57_vm0, %v49_v3 }
  0x1c   :  { %125 = vmatmul.msk.f32.vlgmr.msra.gmra.mxu0 %vm57_vm0, %v47_v4  ;;  %126 = vmatmul.msk.f32.vlgmr.msra.gmra.mxu1 %vm57_vm0, %v48_v5 }
  0x99   :  { %v93_v7 = vpop.f32.mrf.mxu0  ;;  %v96_v8 = vpop.f32.mrf.mxu1 }
  0x9a   :  { %v94_v9 = vadd.f32 %v136_v6, %v93_v7  ;;  %v97_v10 = vadd.f32 %v136_v6, %v96_v8 }
  0x9c   :  { %99 = vst.msk [vmem:[#allocation7] sm:$0xff] %vm57_vm0, %v94_v9 }
  0x9d   :  { %100 = vst.msk [vmem:[#allocation7 + $0x8] sm:$0xff] %vm57_vm0, %v97_v10 }
  0x9e   :  { %113 = dma.vmem_to_hbm [thread:$0]  %s106_s25, 256, %s108_s28, [#allocation4], %s216_s20, %s216_s20, %s217_s21  }
  0x9f   :  { %213 = dma.done.wait [#allocation4], 256  }
  0xa0   :  { %214 = vsyncadd [#allocation4], 4294967040 }
  0xa1   :  { %118 = vsyncpa [#allocation3], 1 }
  0xa2   :  { %119 = vsyncpa [#allocation6], 1 }
  0xa3   :  { %120 = vsyncpa [#allocation4], 1 }

</bundles_post_ra>
